<compile_context>
chip_gen: v7x
topology: tpu7x:2x2x1
jax: 0.10.0
libtpu: 0.0.40
codegen_flags: <defaults>
</compile_context>

<pallas_src>
import math
import functools

import jax
import jax.numpy as jnp
from jax.experimental import pallas as pl
from jax.experimental.pallas import tpu as pltpu


def _fused_synth_kernel(x_ref, w1_ref, b1_ref, wv_ref, bv_ref, w2_ref, b2_ref,
                        pw_ref, pb_ref, o_ref, *, n_head, compute_dtype):
    x = x_ref[0]                                              # (T, C) compute_dtype
    T, C = x.shape
    hs = C // n_head
    f32 = jnp.float32

    # Full-width projections on the MXU (f32 accumulation, biases in f32).
    q = jnp.dot(x, w1_ref[...], preferred_element_type=f32) + b1_ref[...]
    q = jnp.maximum(q, 0.0)                                   # (T, C) f32
    v = jnp.dot(x, wv_ref[...], preferred_element_type=f32) + bv_ref[...]

    q_c = q.astype(compute_dtype)
    v_c = v.astype(compute_dtype)

    # Head-major (nh*T, hs) operand -> ONE score matmul for all heads
    # (w2 stationary in the MXU, fill/drain amortized over nh*T rows).
    q_hm = jnp.concatenate(
        [q_c[:, h * hs:(h + 1) * hs] for h in range(n_head)], axis=0)   # (nh*T, hs)

    s = jnp.dot(q_hm, w2_ref[...], preferred_element_type=f32) + b2_ref[...]
    s = s.reshape(n_head, T, T)                               # leading-dim regroup, cheap

    # Single (T, T) causal mask broadcast over the head dim.
    row = jax.lax.broadcasted_iota(jnp.int32, (T, T), 0)
    col = jax.lax.broadcasted_iota(jnp.int32, (T, T), 1)
    causal = (col <= row)[None]                               # (1, T, T)

    s = jnp.where(causal, s, jnp.float32(-1e10))
    s = s - jnp.max(s, axis=-1, keepdims=True)
    p = jnp.exp(s)
    # EUP approx reciprocal on the reduced-precision path; exact path matches the
    # f32 reference to 1e-5 (softmax rows may not sum exactly to 1 when approx=True).
    approx = jnp.dtype(compute_dtype) != jnp.dtype(jnp.float32)
    p = p * pl.reciprocal(jnp.sum(p, axis=-1, keepdims=True), approx=approx)
    p = p.astype(compute_dtype)                               # (nh, T, T)

    # Per-head PV (T-deep contraction); assemble the (T, C) result lane-dense with
    # ONE concatenate instead of hs-wide masked stores into a VMEM scratch.
    y = jnp.concatenate(
        [jnp.dot(p[h], v_c[:, h * hs:(h + 1) * hs], preferred_element_type=f32)
         for h in range(n_head)], axis=-1)                    # (T, C) f32

    # Output projection fused into the epilogue: (T, C) @ (C, C), lane-dense store.
    out = jnp.dot(y.astype(compute_dtype), pw_ref[...],
                  preferred_element_type=f32) + pb_ref[...]
    o_ref[0] = out.astype(o_ref.dtype)


def prepare_synthesizer_params(params, T, compute_dtype=jnp.bfloat16):
    """One-time weight layout prep -- hoist this out of the per-call forward path."""
    hs, w2_width = params["w2"].shape
    assert T <= w2_width, "T must be <= block_size - 1 (module constraint on w2/b2)"
    cd, f32 = compute_dtype, jnp.float32
    return dict(
        w1_t=params["w1_w"].T.astype(cd),                 # (C, C)  for x @ W1^T
        b1=params["w1_b"].reshape(1, -1).astype(f32),     # (1, C)
        wv_t=params["value_w"].T.astype(cd),              # (C, C)
        bv=params["value_b"].reshape(1, -1).astype(f32),  # (1, C)
        w2=params["w2"][:, :T].astype(cd),                # (hs, T)
        b2=params["b2"][:T].reshape(1, T).astype(f32),    # (1, T)
        proj_t=params["proj_w"].T.astype(cd),             # (C, C)
        proj_b=params["proj_b"].reshape(1, -1).astype(f32),
    )


def synthesizer_attention(x, prepared, n_head, compute_dtype=jnp.bfloat16,
                          vmem_limit_bytes=None):
    """Forward pass. x: (B, T, C); prepared = prepare_synthesizer_params(...).

    vmem_limit_bytes: bump (e.g. to ~96-110 MiB) on v5e/v6e when T/C grow past the
    default scoped VMEM limit; leave None for small shapes.
    """
    B, T, C = x.shape
    assert C % n_head == 0
    hs = C // n_head
    assert prepared["w2"].shape == (hs, T)

    kernel = functools.partial(
        _fused_synth_kernel, n_head=n_head, compute_dtype=compute_dtype)

    return pl.pallas_call(
        kernel,
        out_shape=jax.ShapeDtypeStruct((B, T, C), x.dtype),
        grid_spec=pltpu.PrefetchScalarGridSpec(
            num_scalar_prefetch=0,
            grid=(B,),
            in_specs=[
                pl.BlockSpec((1, T, C), lambda b: (b, 0, 0)),   # x (per batch)
                pl.BlockSpec((C, C),   lambda b: (0, 0)),       # W1^T  (stationary)
                pl.BlockSpec((1, C),   lambda b: (0, 0)),       # b1
                pl.BlockSpec((C, C),   lambda b: (0, 0)),       # Wv^T
                pl.BlockSpec((1, C),   lambda b: (0, 0)),       # bv
                pl.BlockSpec((hs, T),  lambda b: (0, 0)),       # w2[:, :T]
                pl.BlockSpec((1, T),   lambda b: (0, 0)),       # b2[:T]
                pl.BlockSpec((C, C),   lambda b: (0, 0)),       # proj W^T
                pl.BlockSpec((1, C),   lambda b: (0, 0)),       # proj bias
            ],
            out_specs=pl.BlockSpec((1, T, C), lambda b: (b, 0, 0)),
        ),
        compiler_params=pltpu.CompilerParams(
            dimension_semantics=("parallel",),
            vmem_limit_bytes=vmem_limit_bytes,
        ),
    )(x.astype(compute_dtype), prepared["w1_t"], prepared["b1"],
      prepared["wv_t"], prepared["bv"], prepared["w2"], prepared["b2"],
      prepared["proj_t"], prepared["proj_b"])


def reference_jax(x, params, n_head):
    """Pure-JAX reference mirroring the PyTorch forward (eval mode, f32)."""
    B, T, C = x.shape
    hs = C // n_head
    h = jnp.maximum(x @ params["w1_w"].T + params["w1_b"], 0.0)
    h = h.reshape(B, T, n_head, hs).transpose(0, 2, 1, 3)              # (B, nh, T, hs)
    s = jnp.einsum("bhtd,dk->bhtk", h, params["w2"][:, :T]) + params["b2"][:T]
    mask = jnp.tril(jnp.ones((T, T), dtype=bool))
    s = jnp.where(mask[None, None], s, -1e10)
    p = jax.nn.softmax(s, axis=-1)
    v = (x @ params["value_w"].T + params["value_b"]).reshape(B, T, n_head, hs)
    v = v.transpose(0, 2, 1, 3)
    y = jnp.einsum("bhtk,bhkd->bhtd", p, v).transpose(0, 2, 1, 3).reshape(B, T, C)
    return y @ params["proj_w"].T + params["proj_b"]


if __name__ == "__main__":
    # Small config consistent with the module: n_embd=32, n_head=4, block_size=16.
    B, T, C, n_head, block_size = 2, 8, 32, 4, 16
    hs = C // n_head

    key = jax.random.PRNGKey(0)
    ks = jax.random.split(key, 8)

    def linear_init(kw, kb, fan_in, shape_w, shape_b):
        bound = 1.0 / math.sqrt(fan_in)
        w = jax.random.uniform(kw, shape_w, jnp.float32, -bound, bound)
        b = jax.random.uniform(kb, shape_b, jnp.float32, -bound, bound)
        return w, b

    w1_w, w1_b = linear_init(ks[0], ks[1], C, (C, C), (C,))
    value_w, value_b = linear_init(ks[2], ks[3], C, (C, C), (C,))
    proj_w, proj_b = linear_init(ks[4], ks[5], C, (C, C), (C,))
    w2 = jax.random.uniform(ks[6], (hs, block_size - 1), jnp.float32, -0.001, 0.001)
    b2 = jnp.zeros((block_size - 1,), jnp.float32)

    params = dict(
        w1_w=w1_w, w1_b=w1_b,
        value_w=value_w, value_b=value_b,
        proj_w=proj_w, proj_b=proj_b,
        w2=w2, b2=b2,
    )

    x = jax.random.normal(ks[7], (B, T, C), jnp.float32)
    ref = reference_jax(x, params, n_head)

    # 1) Exact path: f32 MXU operands -- must match the f32 reference tightly.
    prep_f32 = prepare_synthesizer_params(params, T, compute_dtype=jnp.float32)
    out_f32 = jax.block_until_ready(
        synthesizer_attention(x, prep_f32, n_head, compute_dtype=jnp.float32))
    assert out_f32.shape == (B, T, C)
    assert jnp.allclose(out_f32, ref, atol=1e-5, rtol=1e-5), "f32 mismatch vs reference"

    # 2) Fast path: bf16 MXU operands with f32 accumulation (looser tolerance).
    prep_bf16 = prepare_synthesizer_params(params, T, compute_dtype=jnp.bfloat16)
    out_bf16 = jax.block_until_ready(
        synthesizer_attention(x, prep_bf16, n_head, compute_dtype=jnp.bfloat16))
    assert out_bf16.shape == (B, T, C)
    assert jnp.allclose(out_bf16, ref, atol=5e-2, rtol=5e-2), "bf16 mismatch vs reference"

    print("KERNEL_OK")
</pallas_src>

<mosaic_0001>
module attributes {stable_mosaic.version = 11 : i64} {
  func.func @_fused_synth_kernel(%arg0: i32, %arg1: memref<1x8x32xf32, #tpu.memory_space<vmem>>, %arg2: memref<32x32xf32, #tpu.memory_space<vmem>>, %arg3: memref<1x32xf32, #tpu.memory_space<vmem>>, %arg4: memref<32x32xf32, #tpu.memory_space<vmem>>, %arg5: memref<1x32xf32, #tpu.memory_space<vmem>>, %arg6: memref<8x8xf32, #tpu.memory_space<vmem>>, %arg7: memref<1x8xf32, #tpu.memory_space<vmem>>, %arg8: memref<32x32xf32, #tpu.memory_space<vmem>>, %arg9: memref<1x32xf32, #tpu.memory_space<vmem>>, %arg10: memref<1x8x32xf32, #tpu.memory_space<vmem>>) attributes {dimension_semantics = [#tpu.dimension_semantics<parallel>], iteration_bounds = array<i64: 2>, scalar_prefetch = 0 : i64, scratch_operands = 0 : i64, tpu.core_type = #tpu.core_type<tc>, window_params = [{transform_indices = @transform_0, window_bounds = array<i64: 1, 8, 32>}, {pipeline_mode = #tpu.pipeline_mode<synchronous>, transform_indices = @transform_1, window_bounds = array<i64: 32, 32>}, {pipeline_mode = #tpu.pipeline_mode<synchronous>, transform_indices = @transform_2, window_bounds = array<i64: 1, 32>}, {pipeline_mode = #tpu.pipeline_mode<synchronous>, transform_indices = @transform_3, window_bounds = array<i64: 32, 32>}, {pipeline_mode = #tpu.pipeline_mode<synchronous>, transform_indices = @transform_4, window_bounds = array<i64: 1, 32>}, {pipeline_mode = #tpu.pipeline_mode<synchronous>, transform_indices = @transform_5, window_bounds = array<i64: 8, 8>}, {pipeline_mode = #tpu.pipeline_mode<synchronous>, transform_indices = @transform_6, window_bounds = array<i64: 1, 8>}, {pipeline_mode = #tpu.pipeline_mode<synchronous>, transform_indices = @transform_7, window_bounds = array<i64: 32, 32>}, {pipeline_mode = #tpu.pipeline_mode<synchronous>, transform_indices = @transform_8, window_bounds = array<i64: 1, 32>}, {transform_indices = @transform_9, window_bounds = array<i64: 1, 8, 32>}]} {
    %c0 = arith.constant 0 : index
    %c0_0 = arith.constant 0 : index
    %c0_1 = arith.constant 0 : index
    %0 = vector.load %arg1[%c0, %c0_0, %c0_1] : memref<1x8x32xf32, #tpu.memory_space<vmem>>, vector<1x8x32xf32>
    %1 = vector.shape_cast %0 : vector<1x8x32xf32> to vector<8x32xf32>
    %c0_2 = arith.constant 0 : index
    %c0_3 = arith.constant 0 : index
    %2 = vector.load %arg2[%c0_2, %c0_3] : memref<32x32xf32, #tpu.memory_space<vmem>>, vector<32x32xf32>
    %cst = arith.constant dense<0.000000e+00> : vector<8x32xf32>
    %3 = tpu.matmul %1, %2, %cst {dimension_numbers = #tpu.dot_dimension_numbers<[1], [0], [0], [1], [0, 0, 1, 1], [], []>} : vector<8x32xf32>, vector<32x32xf32>, vector<8x32xf32> -> vector<8x32xf32>
    %c0_4 = arith.constant 0 : index
    %c0_5 = arith.constant 0 : index
    %4 = vector.load %arg3[%c0_4, %c0_5] : memref<1x32xf32, #tpu.memory_space<vmem>>, vector<1x32xf32>
    %5 = vector.broadcast %4 : vector<1x32xf32> to vector<8x32xf32>
    %6 = arith.addf %3, %5 : vector<8x32xf32>
    %cst_6 = arith.constant 0.000000e+00 : f32
    %7 = vector.broadcast %cst_6 : f32 to vector<8x32xf32>
    %8 = arith.maximumf %6, %7 : vector<8x32xf32>
    %c0_7 = arith.constant 0 : index
    %c0_8 = arith.constant 0 : index
    %9 = vector.load %arg4[%c0_7, %c0_8] : memref<32x32xf32, #tpu.memory_space<vmem>>, vector<32x32xf32>
    %cst_9 = arith.constant dense<0.000000e+00> : vector<8x32xf32>
    %10 = tpu.matmul %1, %9, %cst_9 {dimension_numbers = #tpu.dot_dimension_numbers<[1], [0], [0], [1], [0, 0, 1, 1], [], []>} : vector<8x32xf32>, vector<32x32xf32>, vector<8x32xf32> -> vector<8x32xf32>
    %c0_10 = arith.constant 0 : index
    %c0_11 = arith.constant 0 : index
    %11 = vector.load %arg5[%c0_10, %c0_11] : memref<1x32xf32, #tpu.memory_space<vmem>>, vector<1x32xf32>
    %12 = vector.broadcast %11 : vector<1x32xf32> to vector<8x32xf32>
    %13 = arith.addf %10, %12 : vector<8x32xf32>
    %14 = vector.extract_strided_slice %8 {offsets = [0, 0], sizes = [8, 8], strides = [1, 1]} : vector<8x32xf32> to vector<8x8xf32>
    %15 = vector.extract_strided_slice %8 {offsets = [0, 8], sizes = [8, 8], strides = [1, 1]} : vector<8x32xf32> to vector<8x8xf32>
    %16 = vector.extract_strided_slice %8 {offsets = [0, 16], sizes = [8, 8], strides = [1, 1]} : vector<8x32xf32> to vector<8x8xf32>
    %17 = vector.extract_strided_slice %8 {offsets = [0, 24], sizes = [8, 8], strides = [1, 1]} : vector<8x32xf32> to vector<8x8xf32>
    %18 = tpu.concatenate %14, %15, %16, %17 in 0 : vector<8x8xf32>, vector<8x8xf32>, vector<8x8xf32>, vector<8x8xf32> -> vector<32x8xf32>
    %c0_12 = arith.constant 0 : index
    %c0_13 = arith.constant 0 : index
    %19 = vector.load %arg6[%c0_12, %c0_13] : memref<8x8xf32, #tpu.memory_space<vmem>>, vector<8x8xf32>
    %cst_14 = arith.constant dense<0.000000e+00> : vector<32x8xf32>
    %20 = tpu.matmul %18, %19, %cst_14 {dimension_numbers = #tpu.dot_dimension_numbers<[1], [0], [0], [1], [0, 0, 1, 1], [], []>} : vector<32x8xf32>, vector<8x8xf32>, vector<32x8xf32> -> vector<32x8xf32>
    %c0_15 = arith.constant 0 : index
    %c0_16 = arith.constant 0 : index
    %21 = vector.load %arg7[%c0_15, %c0_16] : memref<1x8xf32, #tpu.memory_space<vmem>>, vector<1x8xf32>
    %22 = vector.broadcast %21 : vector<1x8xf32> to vector<32x8xf32>
    %23 = arith.addf %20, %22 : vector<32x8xf32>
    %24 = vector.shape_cast %23 : vector<32x8xf32> to vector<4x8x8xf32>
    %25 = tpu.iota {dimensions = array<i32: 0>} : vector<8x8xi32>
    %26 = tpu.iota {dimensions = array<i32: 1>} : vector<8x8xi32>
    %27 = arith.cmpi sle, %26, %25 : vector<8x8xi32>
    %28 = vector.shape_cast %27 : vector<8x8xi1> to vector<1x8x8xi1>
    %cst_17 = arith.constant -1.000000e+10 : f32
    %29 = vector.shape_cast %28 : vector<1x8x8xi1> to vector<1x8x8xi1>
    %30 = vector.broadcast %29 : vector<1x8x8xi1> to vector<4x8x8xi1>
    %31 = vector.broadcast %cst_17 : f32 to vector<4x8x8xf32>
    %32 = arith.select %30, %24, %31 : vector<4x8x8xi1>, vector<4x8x8xf32>
    %cst_18 = arith.constant dense<0xFF800000> : vector<4x8xf32>
    %33 = vector.multi_reduction <maximumf>, %32, %cst_18 [2] : vector<4x8x8xf32> to vector<4x8xf32>
    %34 = vector.shape_cast %33 : vector<4x8xf32> to vector<4x8x1xf32>
    %35 = vector.broadcast %34 : vector<4x8x1xf32> to vector<4x8x8xf32>
    %36 = arith.subf %32, %35 : vector<4x8x8xf32>
    %37 = math.exp %36 : vector<4x8x8xf32>
    %cst_19 = arith.constant dense<0.000000e+00> : vector<4x8xf32>
    %38 = vector.multi_reduction <add>, %37, %cst_19 [2] : vector<4x8x8xf32> to vector<4x8xf32>
    %39 = vector.shape_cast %38 : vector<4x8xf32> to vector<4x8x1xf32>
    %40 = tpu.reciprocal %39 : vector<4x8x1xf32> -> vector<4x8x1xf32>
    %41 = vector.broadcast %40 : vector<4x8x1xf32> to vector<4x8x8xf32>
    %42 = arith.mulf %37, %41 : vector<4x8x8xf32>
    %43 = vector.extract_strided_slice %42 {offsets = [0, 0, 0], sizes = [1, 8, 8], strides = [1, 1, 1]} : vector<4x8x8xf32> to vector<1x8x8xf32>
    %44 = vector.shape_cast %43 : vector<1x8x8xf32> to vector<8x8xf32>
    %45 = vector.extract_strided_slice %13 {offsets = [0, 0], sizes = [8, 8], strides = [1, 1]} : vector<8x32xf32> to vector<8x8xf32>
    %cst_20 = arith.constant dense<0.000000e+00> : vector<8x8xf32>
    %46 = tpu.matmul %44, %45, %cst_20 {dimension_numbers = #tpu.dot_dimension_numbers<[1], [0], [0], [1], [0, 0, 1, 1], [], []>} : vector<8x8xf32>, vector<8x8xf32>, vector<8x8xf32> -> vector<8x8xf32>
    %47 = vector.extract_strided_slice %42 {offsets = [1, 0, 0], sizes = [1, 8, 8], strides = [1, 1, 1]} : vector<4x8x8xf32> to vector<1x8x8xf32>
    %48 = vector.shape_cast %47 : vector<1x8x8xf32> to vector<8x8xf32>
    %49 = vector.extract_strided_slice %13 {offsets = [0, 8], sizes = [8, 8], strides = [1, 1]} : vector<8x32xf32> to vector<8x8xf32>
    %cst_21 = arith.constant dense<0.000000e+00> : vector<8x8xf32>
    %50 = tpu.matmul %48, %49, %cst_21 {dimension_numbers = #tpu.dot_dimension_numbers<[1], [0], [0], [1], [0, 0, 1, 1], [], []>} : vector<8x8xf32>, vector<8x8xf32>, vector<8x8xf32> -> vector<8x8xf32>
    %51 = vector.extract_strided_slice %42 {offsets = [2, 0, 0], sizes = [1, 8, 8], strides = [1, 1, 1]} : vector<4x8x8xf32> to vector<1x8x8xf32>
    %52 = vector.shape_cast %51 : vector<1x8x8xf32> to vector<8x8xf32>
    %53 = vector.extract_strided_slice %13 {offsets = [0, 16], sizes = [8, 8], strides = [1, 1]} : vector<8x32xf32> to vector<8x8xf32>
    %cst_22 = arith.constant dense<0.000000e+00> : vector<8x8xf32>
    %54 = tpu.matmul %52, %53, %cst_22 {dimension_numbers = #tpu.dot_dimension_numbers<[1], [0], [0], [1], [0, 0, 1, 1], [], []>} : vector<8x8xf32>, vector<8x8xf32>, vector<8x8xf32> -> vector<8x8xf32>
    %55 = vector.extract_strided_slice %42 {offsets = [3, 0, 0], sizes = [1, 8, 8], strides = [1, 1, 1]} : vector<4x8x8xf32> to vector<1x8x8xf32>
    %56 = vector.shape_cast %55 : vector<1x8x8xf32> to vector<8x8xf32>
    %57 = vector.extract_strided_slice %13 {offsets = [0, 24], sizes = [8, 8], strides = [1, 1]} : vector<8x32xf32> to vector<8x8xf32>
    %cst_23 = arith.constant dense<0.000000e+00> : vector<8x8xf32>
    %58 = tpu.matmul %56, %57, %cst_23 {dimension_numbers = #tpu.dot_dimension_numbers<[1], [0], [0], [1], [0, 0, 1, 1], [], []>} : vector<8x8xf32>, vector<8x8xf32>, vector<8x8xf32> -> vector<8x8xf32>
    %59 = tpu.concatenate %46, %50, %54, %58 in 1 : vector<8x8xf32>, vector<8x8xf32>, vector<8x8xf32>, vector<8x8xf32> -> vector<8x32xf32>
    %c0_24 = arith.constant 0 : index
    %c0_25 = arith.constant 0 : index
    %60 = vector.load %arg8[%c0_24, %c0_25] : memref<32x32xf32, #tpu.memory_space<vmem>>, vector<32x32xf32>
    %cst_26 = arith.constant dense<0.000000e+00> : vector<8x32xf32>
    %61 = tpu.matmul %59, %60, %cst_26 {dimension_numbers = #tpu.dot_dimension_numbers<[1], [0], [0], [1], [0, 0, 1, 1], [], []>} : vector<8x32xf32>, vector<32x32xf32>, vector<8x32xf32> -> vector<8x32xf32>
    %c0_27 = arith.constant 0 : index
    %c0_28 = arith.constant 0 : index
    %62 = vector.load %arg9[%c0_27, %c0_28] : memref<1x32xf32, #tpu.memory_space<vmem>>, vector<1x32xf32>
    %63 = vector.broadcast %62 : vector<1x32xf32> to vector<8x32xf32>
    %64 = arith.addf %61, %63 : vector<8x32xf32>
    %c0_29 = arith.constant 0 : index
    %c0_30 = arith.constant 0 : index
    %c0_31 = arith.constant 0 : index
    %65 = vector.load %arg10[%c0_29, %c0_30, %c0_31] : memref<1x8x32xf32, #tpu.memory_space<vmem>>, vector<1x8x32xf32>
    %66 = vector.shape_cast %65 : vector<1x8x32xf32> to vector<8x32xf32>
    %67 = vector.shape_cast %64 : vector<8x32xf32> to vector<1x8x32xf32>
    tpu.vector_store %arg10[%c0_29, %c0_30, %c0_31], %67 {strides = array<i32>} : memref<1x8x32xf32, #tpu.memory_space<vmem>>, vector<1x8x32xf32>,
    return
  }
  func.func @transform_0(%arg0: i32) -> (i32, i32, i32) {
    %c0_i32 = arith.constant 0 : i32
    %c0_i32_0 = arith.constant 0 : i32
    %c0_i32_1 = arith.constant 0 : i32
    return %arg0, %c0_i32, %c0_i32_0 : i32, i32, i32
  }
  func.func @transform_1(%arg0: i32) -> (i32, i32) {
    %c0_i32 = arith.constant 0 : i32
    %c0_i32_0 = arith.constant 0 : i32
    %c0_i32_1 = arith.constant 0 : i32
    return %c0_i32, %c0_i32_0 : i32, i32
  }
  func.func @transform_2(%arg0: i32) -> (i32, i32) {
    %c0_i32 = arith.constant 0 : i32
    %c0_i32_0 = arith.constant 0 : i32
    %c0_i32_1 = arith.constant 0 : i32
    return %c0_i32, %c0_i32_0 : i32, i32
  }
  func.func @transform_3(%arg0: i32) -> (i32, i32) {
    %c0_i32 = arith.constant 0 : i32
    %c0_i32_0 = arith.constant 0 : i32
    %c0_i32_1 = arith.constant 0 : i32
    return %c0_i32, %c0_i32_0 : i32, i32
  }
  func.func @transform_4(%arg0: i32) -> (i32, i32) {
    %c0_i32 = arith.constant 0 : i32
    %c0_i32_0 = arith.constant 0 : i32
    %c0_i32_1 = arith.constant 0 : i32
    return %c0_i32, %c0_i32_0 : i32, i32
  }
  func.func @transform_5(%arg0: i32) -> (i32, i32) {
    %c0_i32 = arith.constant 0 : i32
    %c0_i32_0 = arith.constant 0 : i32
    %c0_i32_1 = arith.constant 0 : i32
    return %c0_i32, %c0_i32_0 : i32, i32
  }
  func.func @transform_6(%arg0: i32) -> (i32, i32) {
    %c0_i32 = arith.constant 0 : i32
    %c0_i32_0 = arith.constant 0 : i32
    %c0_i32_1 = arith.constant 0 : i32
    return %c0_i32, %c0_i32_0 : i32, i32
  }
  func.func @transform_7(%arg0: i32) -> (i32, i32) {
    %c0_i32 = arith.constant 0 : i32
    %c0_i32_0 = arith.constant 0 : i32
    %c0_i32_1 = arith.constant 0 : i32
    return %c0_i32, %c0_i32_0 : i32, i32
  }
  func.func @transform_8(%arg0: i32) -> (i32, i32) {
    %c0_i32 = arith.constant 0 : i32
    %c0_i32_0 = arith.constant 0 : i32
    %c0_i32_1 = arith.constant 0 : i32
    return %c0_i32, %c0_i32_0 : i32, i32
  }
  func.func @transform_9(%arg0: i32) -> (i32, i32, i32) {
    %c0_i32 = arith.constant 0 : i32
    %c0_i32_0 = arith.constant 0 : i32
    %c0_i32_1 = arith.constant 0 : i32
    return %arg0, %c0_i32, %c0_i32_0 : i32, i32, i32
  }
}

</mosaic_0001>

<bundles_post_ra>
// kernel: tpu_custom_call.1
= control target key start
LH: loop header
LB: loop body
LE: loop exit
PB: predicated region body
PF: predicated region fallthrough
CT: control target
= control target key end

     0   :  { %s2080_s0 = inlined_call_operand.hbm [shape: f32[2,8,32], index: 0, kind: input, shape index: {}]   ;;  %s2081_s1 = inlined_call_operand.hbm [shape: f32[32,32], index: 1, kind: input, shape index: {}]   ;;  %s2082_s2 = inlined_call_operand.vmem [shape: f32[1,32], index: 2, kind: input, shape index: {}]   ;;  %s2083_s3 = inlined_call_operand.hbm [shape: f32[32,32], index: 3, kind: input, shape index: {}]   ;;  %s2084_s4 = inlined_call_operand.vmem [shape: f32[1,32], index: 4, kind: input, shape index: {}]   ;;  %s2085_s5 = inlined_call_operand.vmem [shape: f32[8,8], index: 5, kind: input, shape index: {}]   ;;  %s2086_s6 = inlined_call_operand.vmem [shape: f32[1,8], index: 6, kind: input, shape index: {}]   ;;  %s2087_s7 = inlined_call_operand.hbm [shape: f32[32,32], index: 7, kind: input, shape index: {}]   ;;  %s2088_s8 = inlined_call_operand.vmem [shape: f32[1,32], index: 8, kind: input, shape index: {}]   ;;  %s2089_s9 = inlined_call_operand.hbm [shape: f32[2,8,32], index: 9, kind: output, shape index: {}]  }
   0x1   :  { %2096 = sst [smem:[#allocation17_spill]] %s2089_s9 }
   0x2   :  { %14 = vsyncpa [#allocation3], 0 }
   0x3   :  { %16 = vsyncpa [#allocation3 + $0x1], 0 }
   0x4   :  { %17 = vsyncpa [#allocation6], 0 }
   0x5   :  { %18 = vsyncpa [#allocation9], 0 }
   0x6   :  { %19 = vsyncpa [#allocation4], 0 }
   0x7   :  { %21 = vsyncpa [#allocation4 + $0x1], 0  ;;  %s1743_s30 = smov 0   ;;  %s1745_s10 = smov 0  }
   0x8   :  { %s1747_s11 = smov 0   ;;  %s1749_s12 = smov 0  }
   0x9 LB: > { %2097 = sst [smem:[#allocation15_spill]] %s1663_s30  ;;  %s1764_s13 = sadd.s32 4294967295, %s1675_s12   ;;  %s1675_s12 = sphi %s1749_s12, %s2121_s12   ;;  %s1671_s11 = sphi %s1747_s11, %s2120_s11   ;;  %s1667_s10 = sphi %s1745_s10, %s2119_s10   ;;  %s1663_s30 = sphi %s1743_s30, %s2118_s30  }
   0xa   : > { %s1241_s14 = sadd.s32 4294967294, %s1675_s12   ;;  %p47_p0 = scmp.ne.s32.totalorder %s1667_s10, %s1663_s30 }
   0xb   : > { %p2090_p1 = scmp.eq.s32.totalorder %s1764_s13, 0  ;;  %p245_p3 = scmp.eq.s32.totalorder %s1241_s14, 1 }
   0xc   : > { %p1242_p5 = scmp.ge.s32.totalorder %s1675_s12, 1  ;;  %p252_p7 = scmp.lt.s32.totalorder %s1675_s12, 3 }
   0xd   : > { %p1773_p4 = por %p2090_p1, %p47_p0  ;;  %p1778_p6 = por %p245_p3, %p47_p0 }
   0xe   : > { %p1783_p8 = pnand %p1242_p5, %p252_p7  ;;  %s1677_s18 = smov [#allocation5]  }
   0xf   : > { %s2098_s15 = scalar_select %p1773_p4, 1, 0 }
  0x10   : > { %s2099_s16 = scalar_select %p1778_p6, 1, 0 }
  0x11   : > { %s2101_s17 = scalar_select %p1783_p8, 1, 0 }
  0x12   : > { %2100 = sst [smem:[#allocation16_spill]] %s2099_s16  ;;  %s264_s19 = sshll.u32 %s1677_s18, 4  ;;  %s1787_s19 = int_to_ptr.vmem [resolvable:$true] %s264_s19 }
  0x13   : > { %p1399_p9 = pneg %p1783_p8  ;;  %s1678_s21 = smov [#allocation7]  }
  0x14   : > { %s280_s22 = sshll.u32 %s1678_s21, 4  ;;  %s1679_s23 = smov [#allocation8]   ;;  %s1798_s22 = int_to_ptr.vmem [resolvable:$true] %s280_s22 }
  0x15   : > { %p1794_p11 = pnand %p1399_p9, %p2090_p1  ;;  %s1800_s24 = sshll.u32 %s1679_s23, 4  ;;  %s303_s24 = int_to_ptr.vmem [resolvable:$true] %s1800_s24 }
  0x16   : > { %s1487_s27 = scalar_lea.hbm %s2081_s1, 512 }
  0x17   : > { %p1488_p12 = scmp.ne.s32.totalorder %s2081_s1, %s1487_s27  ;;  %p1810_p13 = pneg %p1794_p11 }
  0x18   : > { %p1494_p5 = scmp.lt.u32.totalorder %s1487_s27, %s2081_s1 }
  0x19   : > { %p1490_p0 = pnand %p1810_p13, %p1488_p12 }
  0x1b   : > { %p1491_p3 = pneg %p1490_p0 }
  0x1d   : > { %p1496_p7 = pnand %p1494_p5, %p1491_p3 }
  0x1f   : > { %1499 = shalt.err (!%p1496_p7)
}
  0x20   : > { %s1500_s23 = scalar_lea.vmem %s1787_s19, 512  ;;  %p1508_p2 = scmp.lt.s32.totalorder %s1787_s19, %s1787_s19 }
  0x21   : > { %p1501_p9 = scmp.ne.s32.totalorder %s1787_s19, %s1500_s23  ;;  %p1509_p6 = scmp.lt.s32.totalorder %s1500_s23, %s1500_s23 }
  0x23   : > { %p1503_p10 = pnand %p1501_p9, %p1810_p13  ;;  %p1510_p12 = por %p1509_p6, %p1508_p2 }
  0x25   : > { %p1504_p1 = pneg %p1503_p10 }
  0x27   : > { %p1511_p0 = pnand %p1510_p12, %p1504_p1 }
  0x29   : > { %1514 = shalt.err (!%p1511_p0)
}
  0x2a   : > { %s1680_s25 = smov 128   ;;  %s1681_s26 = smov 8  }
  0x2b   : > { %1402 = dma.hbm_to_vmem [thread:$0]  (!%p1794_p11), %s2081_s1, 512, %s1787_s19, [#allocation6], %s1680_s25, %s1680_s25, %s1681_s26  }
  0x2c   : > { %s1515_s21 = scalar_lea.hbm %s2083_s3, 512 }
  0x2d   : > { %p1516_p1 = scmp.ne.s32.totalorder %s2083_s3, %s1515_s21  ;;  %p1522_p10 = scmp.lt.u32.totalorder %s1515_s21, %s2083_s3 }
  0x2f   : > { %p1518_p2 = pnand %p1516_p1, %p1810_p13 }
  0x31   : > { %p1519_p6 = pneg %p1518_p2 }
  0x33   : > { %p1524_p3 = pnand %p1522_p10, %p1519_p6 }
  0x35   : > { %1527 = shalt.err (!%p1524_p3)
}
  0x36   : > { %s1528_s19 = scalar_lea.vmem %s1798_s22, 512  ;;  %p1536_p12 = scmp.lt.s32.totalorder %s1798_s22, %s1798_s22 }
  0x37   : > { %p1529_p5 = scmp.ne.s32.totalorder %s1798_s22, %s1528_s19  ;;  %p1537_p0 = scmp.lt.s32.totalorder %s1528_s19, %s1528_s19 }
  0x39   : > { %p1531_p7 = pnand %p1529_p5, %p1810_p13  ;;  %p1538_p1 = por %p1537_p0, %p1536_p12 }
  0x3b   : > { %p1532_p9 = pneg %p1531_p7 }
  0x3d   : > { %p1539_p2 = pnand %p1538_p1, %p1532_p9 }
  0x3f   : > { %1542 = shalt.err (!%p1539_p2)
}
  0x40   : > { %1405 = dma.hbm_to_vmem [thread:$0]  (!%p1794_p11), %s2083_s3, 512, %s1798_s22, [#allocation6], %s1680_s25, %s1680_s25, %s1681_s26  }
  0x41   : > { %s1543_s28 = scalar_lea.hbm %s2087_s7, 512 }
  0x42   : > { %p1544_p6 = scmp.ne.s32.totalorder %s2087_s7, %s1543_s28  ;;  %p1550_p5 = scmp.lt.u32.totalorder %s1543_s28, %s2087_s7 }
  0x44   : > { %p1546_p10 = pnand %p1544_p6, %p1810_p13 }
  0x46   : > { %p1547_p3 = pneg %p1546_p10 }
  0x48   : > { %p1552_p7 = pnand %p1550_p5, %p1547_p3 }
  0x4a   : > { %1555 = shalt.err (!%p1552_p7)
}
  0x4b   : > { %s1556_s19 = scalar_lea.vmem %s303_s24, 512  ;;  %p1564_p1 = scmp.lt.s32.totalorder %s303_s24, %s303_s24 }
  0x4c   : > { %p1557_p9 = scmp.ne.s32.totalorder %s303_s24, %s1556_s19  ;;  %p1565_p2 = scmp.lt.s32.totalorder %s1556_s19, %s1556_s19 }
  0x4e   : > { %p1559_p12 = pnand %p1557_p9, %p1810_p13  ;;  %p1566_p4 = por %p1565_p2, %p1564_p1 }
  0x50   : > { %p1560_p0 = pneg %p1559_p12 }
  0x52   : > { %p1567_p8 = pnand %p1566_p4, %p1560_p0 }
  0x54   : > { %1570 = shalt.err (!%p1567_p8)
}
  0x55   : > { %1408 = dma.hbm_to_vmem [thread:$0]  (!%p1794_p11), %s2087_s7, 512, %s303_s24, [#allocation9], %s1680_s25, %s1680_s25, %s1681_s26  }
  0x56   : > { %s1883_s14 = sadd.s32 1, %s1675_s12   ;;  %s34_s30 = sadd.s32 1, %s1671_s11 }
  0x57   : > { %s31_s20 = ssub.s32 %s1675_s12, %s1883_s14  ;;  %p41_p8 = scmp.ne.s32.totalorder %s1671_s11, %s1667_s10 }
  0x58   : > { %p32_p4 = scmp.eq.s32.totalorder %s31_s20, 0  ;;  %p42_p13 = scmp.eq.s32.totalorder %s1675_s12, 0 }
  0x59   : > { %p1420_p6 = scmp.lt.s32.totalorder %s1675_s12, 2  ;;  %p2104_p3 = scmp.eq.s32.totalorder %s1764_s13, 1 }
  0x5a   : > { %s1893_s16 = scalar_select %p32_p4, %s1671_s11, %s34_s30  }
  0x5b   : > { %p43_p10 = por %p42_p13, %p41_p8  ;;  %p1897_p5 = por %p2104_p3, %p41_p8 }
  0x5c   : > { %s319_s28 = sand.u32 1, %s1671_s11   ;;  %s1248_s29 = sshll.u32 %s1675_s12, 7 }
  0x5d   : > { %s1247_s24 = sshll.u32 %s319_s28, 3  ;;  %s1906_s18 = scalar_lea.hbm %s2080_s0, %s1248_s29 }
  0x5e   : > { %s323_s21 = scalar_lea.vmem [#allocation2], %s1247_s24  ;;  %p1908_p11 = pnand %p1420_p6, %p43_p10 }
  0x5f   : > { %s330_s23 = sshll.u32 %s323_s21, 4  ;;  %s320_s22 = scalar_lea.sflag [#allocation3], %s319_s28  ;;  %s1912_s23 = int_to_ptr.vmem [resolvable:$true] %s330_s23 }
  0x60   : > { %s1571_s9 = scalar_lea.hbm %s1906_s18, 128  ;;  %p1573_p9 = pneg %p1908_p11 }
  0x61   : > { %p1572_p7 = scmp.ne.s32.totalorder %s1906_s18, %s1571_s9  ;;  %s1576_s29 = scalar_lea.hbm %s2080_s0, 256 }
  0x62   : > { %p1577_p1 = scmp.lt.u32.totalorder %s1906_s18, %s2080_s0  ;;  %p1578_p2 = scmp.lt.u32.totalorder %s1576_s29, %s1571_s9 }
  0x63   : > { %p1574_p12 = pnand %p1573_p9, %p1572_p7  ;;  %p1580_p8 = scmp.lt.u32.totalorder %s1571_s9, %s1906_s18 }
  0x64   : > { %p1579_p4 = por %p1578_p2, %p1577_p1 }
  0x65   : > { %p1575_p0 = pneg %p1574_p12 }
  0x66   : > { %p1581_p13 = por %p1580_p8, %p1579_p4 }
  0x68   : > { %p1582_p6 = pnand %p1581_p13, %p1575_p0 }
  0x6a   : > { %1585 = shalt.err (!%p1582_p6)
}
  0x6b   : > { %s1586_s28 = scalar_lea.vmem %s1912_s23, 128  ;;  %s1682_s26 = smov [#allocation2]  }
  0x6c   : > { %p1587_p10 = scmp.ne.s32.totalorder %s1912_s23, %s1586_s28  ;;  %s1591_s21 = sshll.u32 %s1682_s26, 4  ;;  %s1592_s21 = int_to_ptr.vmem [resolvable:$false] %s1591_s21 }
  0x6d   : > { %s1593_s20 = scalar_lea.vmem %s1592_s21, 256  ;;  %p1594_p12 = scmp.lt.s32.totalorder %s1912_s23, %s1592_s21 }
  0x6e   : > { %p1589_p3 = pnand %p1587_p10, %p1573_p9  ;;  %p1595_p1 = scmp.lt.s32.totalorder %s1593_s20, %s1586_s28 }
  0x70   : > { %p1590_p7 = pneg %p1589_p3  ;;  %p1596_p2 = por %p1595_p1, %p1594_p12 }
  0x72   : > { %p1597_p4 = pnand %p1596_p2, %p1590_p7 }
  0x74   : > { %1600 = shalt.err (!%p1597_p4)
}
  0x75   : > { %1412 = dma.hbm_to_vmem [thread:$0]  (!%p1908_p11), %s1906_s18, 128, %s1912_s23, %s320_s22  }
  0x76   : > { %p2107_p0 = scmp.ne.s32.totalorder %s2101_s17, 0 }
  0x77   : > { %s1942_s9 = sand.u32 (!%p2107_p0), 1, %s1667_s10   ;;  %p2108_p9 = scmp.ne.s32.totalorder (!%p2107_p0), %s2098_s15, 0 }
  0x78   : > { %339 = sbr.rel (%p2107_p0) target bundleno = 1571 (0x623), region = 56  ;;  %s1250_s30 = sshll.u32 (!%p2107_p0), %s1942_s9, 3 }
  0x79   : > { %s342_s29 = scalar_lea.sflag (!%p2107_p0), [#allocation3], %s1942_s9  ;;  %s345_s24 = scalar_lea.vmem (!%p2107_p0), [#allocation2], %s1250_s30 }
  0x7f   : > { %1646 = dma.done.wait (%p2108_p9), %s342_s29, 128  }
  0x80   : > { %1648 = vsyncadd (%p2108_p9), %s342_s29, 4294967168  ;;  %p2109_p11 = scmp.eq.s32.totalorder %s1764_s13, 0 }
  0x82   : > { %1650 = dma.done.wait (%p2109_p11), [#allocation6], 1024   ;;  %p2110_p8 = pmov %p2109_p11 }
  0x84   : > { %1652 = vsyncadd (%p2110_p8), [#allocation6], 4294966272  ;;  %p2111_p13 = pmov %p2110_p8 }
  0x85   : > { %p2112_p6 = pmov %p2110_p8 }
  0x86   : > { %1654 = dma.done.wait (%p2111_p13), [#allocation9], 512  }
  0x87   : > { %1656 = vsyncadd (%p2112_p6), [#allocation9], 4294966784  ;;  %v1683_v0 = vmov 0.0|0.0   ;;  %vm1684_vm0 = vmmov 0   ;;  %v1685_v1 = vmov 0.0   ;;  %v393_v2 = vld [vmem:[#allocation5] sm:$0xff]  ;;  %v669_v28 = vlaneseq }
  0x88   : > { %1363 = vmatprep.subr.bf16.mxu0 %v1683_v0  ;;  %1310 = vmatprep.mubr.msk.f32.mxu0 %vm1684_vm0, %v1685_v1  ;;  %v394_v3 = vld [vmem:[#allocation5 + $0x8] sm:$0xff]  ;;  %v395_v4 = vld [vmem:[#allocation5 + $0x10] sm:$0xff]  ;;  %v396_v6 = vld [vmem:[#allocation5 + $0x18] sm:$0xff]  ;;  %vm404_vm1 = vcmask 261120   ;;  %vm575_vm2 = vcmask 64512   ;;  %s1686_s19 = smov 104  }
  0x89   : > { %1369 = vmatprep.subr.bf16.mxu1 %v1683_v0  ;;  %1321 = vmatprep.mubr.msk.f32.mxu1 %vm1684_vm0, %v1685_v1  ;;  %v1364_v5 = vpack.c.bf16 %v394_v3, %v393_v2  ;;  %v1367_v7 = vpack.c.bf16 %v396_v6, %v395_v4  ;;  %v392_v8 = vld [vmem:[%s345_s24] sm:$0xff]  ;;  %v479_v9 = vld [vmem:[#allocation7] sm:$0xff]  ;;  %v480_v10 = vld [vmem:[#allocation7 + $0x8] sm:$0xff]  ;;  %s1687_s22 = smov 120   ;;  %s1688_s25 = smov 112   ;;  %v670_v29 = vshrl.u32 %v669_v28, 7 }
  0x8a   : > { %v567_v11 = vld [vmem:[%s2085_s5] sm:$0xff]  ;;  %v1370_v12 = vpack.c.bf16 %v480_v10, %v479_v9  ;;  %v482_v14 = vld [vmem:[#allocation7 + $0x18] sm:$0xff]  ;;  %v672_v30 = vand.u32 127, %v669_v28  ;;  %s1689_s29 = smov 8   ;;  %s1690_s24 = smov 16   ;;  %vm1039_vm4 = vcmask 130048  }
  0x8b   : > { %1365 = vmatpush3.bf16.msra.mxu0 %v1364_v5  ;;  %v481_v13 = vld [vmem:[#allocation7 + $0x10] sm:$0xff]  ;;  %s1691_s15 = smov 24   ;;  %vm1041_vm5 = vcmask 195584   ;;  %s1271_s23 = sshll.u32 %s1764_s13, 7 }
  0x8c   : > { %1366 = vmatprep.subr.bf16.mxu0 %v1683_v0  ;;  %1371 = vmatpush3.bf16.msra.mxu1 %v1370_v12  ;;  %v1373_v15 = vpack.c.bf16 %v482_v14, %v481_v13  ;;  %v1255_v16 = vld [vmem:[%s2082_s2] ss:$0 sm:$0xff]  ;;  %vm673_vm3 = vcmp.le.s32.totalorder %v672_v30, %v670_v29  ;;  %s2113_s26 = sld [smem:[#allocation17_spill]]  ;;  %s1129_s20 = scalar_lea.sflag [#allocation4], %s1942_s9 }
  0x8d   : > { %1372 = vmatprep.subr.bf16.mxu1 %v1683_v0  ;;  %v1257_v24 = vld [vmem:[%s2084_s4] ss:$0 sm:$0xff] }
  0x8e   : > { %v1259_v31 = vld [vmem:[%s2086_s6] ss:$0 sm:$0xff] }
  0x8f   : > { %1368 = vmatpush3.bf16.msra.mxu0 %v1367_v7 }
  0x90   : > { %1324 = vmatprep.subr.mxu0 %v567_v11  ;;  %1374 = vmatpush3.bf16.msra.mxu1 %v1373_v15 }
  0x91   : > { %1381 = vmatprep.subr.mxu1 %v567_v11 }
  0x92   : > { %1311 = vmatmul.mubr.msk.f32.vlgmr.msra.gmra.mrb[0].mxu0 %vm404_vm1, %v392_v8  ;;  %s2035_s21 = scalar_lea.hbm %s2113_s26, %s1271_s23 }
  0x93   : > { %1325 = vmatpush3.msra.mxu0 %v567_v11  ;;  %1322 = vmatmul.mubr.msk.f32.vlgmr.msra.gmra.mrb[0].mxu1 %vm404_vm1, %v392_v8 }
  0x94   : > { %1342 = vmatprep.subr.mxu0 %v1685_v1  ;;  %1382 = vmatpush3.msra.mxu1 %v567_v11 }
  0x95   : > { %1332 = vmatprep.subr.mxu1 %v1685_v1 }
 0x165   : > { %v474_v17 = vpop.f32.mrb[0].mxu0 }
 0x166   : > { %v475_v18 = vadd.f32 %v1255_v16, %v474_v17  ;;  %v1312_v19 = vpop.f32.mrb[1].mxu0  ;;  %v556_v25 = vpop.f32.mrb[0].mxu1 }
 0x167   : > { %v557_v26 = vadd.f32 %v1257_v24, %v556_v25  ;;  %v1323_v27 = vpop.f32.mrb[1].mxu1  ;;  %v1045_v24 = vld [vmem:[#allocation8 + $0x10] sm:$0xff]  ;;  %v1046_v25 = vld [vmem:[#allocation8 + $0x18] sm:$0xff] }
 0x168   : > { %v478_v20 = vmax.f32 %v475_v18, 0.0 }
 0x16a   : > { %565 = vrot.lane.b32.xlu1 %v478_v20, %s1686_s19  ;;  %561 = vrot.lane.b32.xlu0 %v478_v20, %s1687_s22 }
 0x16b   : > { %1326 = vmatprep.mubr.msk.f32.mxu0 %vm575_vm2, %v478_v20 }
 0x16e   : > { %563 = vrot.lane.b32.xlu0 %v478_v20, %s1688_s25 }
 0x1dc   : > { %v562_v21 = vpop.permute.xlu0 %561  ;;  %v566_v23 = vpop.permute.xlu1 %565 }
 0x1dd   : > { %1327 = vmatmul.mubr.msk.f32.vlgmr.msra.gmra.mrb[2].mxu0 %vm575_vm2, %v562_v21  ;;  %v1043_v21 = vld [vmem:[#allocation8] sm:$0xff] }
 0x1de   : > { %1344 = vmatprep.mubr.msk.f32.mxu0 %vm1684_vm0, %v1685_v1 }
 0x1e0   : > { %v564_v22 = vpop.permute.xlu0 %563 }
 0x1e1   : > { %1329 = vmatprep.mubr.msk.f32.mxu1 %vm575_vm2, %v564_v22  ;;  %v1044_v22 = vld [vmem:[#allocation8 + $0x8] sm:$0xff] }
 0x1e2   : > { %1330 = vmatmul.mubr.msk.f32.vlgmr.msra.gmra.mrb[2].mxu1 %vm575_vm2, %v566_v23  ;;  %v1376_v23 = vpack.c.bf16 %v1044_v22, %v1043_v21 }
 0x1e3   : > { %1334 = vmatprep.mubr.msk.f32.mxu1 %vm1684_vm0, %v1685_v1  ;;  %1333 = vmatpush3.msra.mxu1 %v557_v26 }
 0x1e4   : > { %1337 = vmatprep.subr.mxu1 %v1685_v1 }
 0x2b0   : > { %v1328_v32 = vpop.f32.mrb[2].mxu0 }
 0x2b1   : > { %v656_v33 = vadd.f32 %v1328_v32, %v1259_v31  ;;  %v650_v34 = vpop.f32.mrb[3].mxu0 }
 0x2b2   : > { %v651_v35 = vadd.f32 %v1259_v31, %v650_v34 }
 0x2b3   : > { %v677_v36 = vsel %vm673_vm3, %v656_v33, -1e+10 }
 0x2b4   : > { %v683_v37 = vsel %vm575_vm2, %v677_v36, -inf  ;;  %v676_v38 = vsel %vm673_vm3, %v651_v35, -1e+10 }
 0x2b5   : > { %v1331_v39 = vpop.f32.mrb[2].mxu1  ;;  %684 = vmax.xlane.f32.xlu0 %v683_v37  ;;  %v680_v40 = vsel %vm575_vm2, %v676_v38, -inf }
 0x2b6   : > { %v666_v41 = vadd.f32 %v1331_v39, %v1259_v31  ;;  %v660_v42 = vpop.f32.mrb[3].mxu1  ;;  %681 = vmax.xlane.f32.xlu1 %v680_v40  ;;  %v1268_v39 = vld [vmem:[%s2088_s8] ss:$0 sm:$0xff] }
 0x2b7   : > { %v661_v43 = vadd.f32 %v1259_v31, %v660_v42 }
 0x2b8   : > { %v679_v44 = vsel %vm673_vm3, %v666_v41, -1e+10 }
 0x2b9   : > { %v689_v45 = vsel %vm575_vm2, %v679_v44, -inf  ;;  %v678_v46 = vsel %vm673_vm3, %v661_v43, -1e+10 }
 0x2ba   : > { %690 = vmax.xlane.f32.xlu1 %v689_v45  ;;  %v686_v47 = vsel %vm575_vm2, %v678_v46, -inf }
 0x2bb   : > { %687 = vmax.xlane.f32.xlu0 %v686_v47 }
 0x342   : > { %v685_v48 = vpop.xlane.xlu0 %684 }
 0x343   : > { %v693_v49 = vsub.f32 %v677_v36, %v685_v48  ;;  %v682_v50 = vpop.xlane.xlu1 %681 }
 0x344   : > { %v692_v51 = vsub.f32 %v676_v38, %v682_v50 }
 0x345   : > { %v698_v52 = vmul.f32 1.442695, %v693_v49 }
 0x346   : > { %v696_v53 = vmul.f32 1.442695, %v692_v51 }
 0x347   : > { %1471 = vpow2.f32 %v698_v52  ;;  %v691_v54 = vpop.xlane.xlu1 %690 }
 0x348   : > { %1473 = vpow2.f32 %v696_v53  ;;  %v695_v55 = vsub.f32 %v679_v44, %v691_v54  ;;  %v688_v56 = vpop.xlane.xlu0 %687 }
 0x349   : > { %v694_v57 = vsub.f32 %v678_v46, %v688_v56 }
 0x34a   : > { %v702_v58 = vmul.f32 1.442695, %v695_v55 }
 0x34b   : > { %v700_v59 = vmul.f32 1.442695, %v694_v57 }
 0x34c   : > { %1475 = vpow2.f32 %v702_v58 }
 0x34d   : > { %1477 = vpow2.f32 %v700_v59 }
 0x351   : > { %v1472_v60 = vpop.eup %1471 }
 0x352   : > { %v1474_v61 = vpop.eup %1473  ;;  %v707_v62 = vsel %vm575_vm2, %v1472_v60, 0.0 }
 0x353   : > { %708 = vadd.xlane.f32.xlu1 %v707_v62  ;;  %v704_v63 = vsel %vm575_vm2, %v1474_v61, 0.0 }
 0x354   : > { %705 = vadd.xlane.f32.xlu0 %v704_v63 }
 0x356   : > { %v1476_v2 = vpop.eup %1475 }
 0x357   : > { %v1478_v3 = vpop.eup %1477  ;;  %v713_v4 = vsel %vm575_vm2, %v1476_v2, 0.0 }
 0x358   : > { %714 = vadd.xlane.f32.xlu1 %v713_v4  ;;  %v710_v5 = vsel %vm575_vm2, %v1478_v3, 0.0 }
 0x359   : > { %711 = vadd.xlane.f32.xlu0 %v710_v5 }
 0x369   : > { %874 = vrot.lane.b32.xlu1 %v557_v26, %s1688_s25 }
 0x36d   : > { %950 = vrot.lane.b32.xlu1 %v557_v26, %s1686_s19  ;;  %s391_s19 = scalar_lea.vmem [#allocation10], %s1250_s30  ;;  %s1692_s30 = smov [#allocation10]  }
 0x36f   : > { %798 = vrot.lane.b32.xlu0 %v557_v26, %s1687_s22  ;;  %v1379_v26 = vpack.c.bf16 %v1046_v25, %v1045_v24  ;;  %s1142_s22 = sshll.u32 %s391_s19, 4  ;;  %s2037_s22 = int_to_ptr.vmem [resolvable:$true] %s1142_s22 }
 0x370   : > { %s1601_s13 = scalar_lea.vmem %s2037_s22, 128 }
 0x371   : > { %p1602_p10 = scmp.ne.s32.totalorder %s2037_s22, %s1601_s13 }
 0x373   : > { %p1603_p3 = pnand %p1602_p10, %p1897_p5 }
 0x375   : > { %p1604_p7 = pneg %p1603_p3 }
 0x3e0   : > { %v709_v6 = vpop.xlane.xlu1 %708 }
 0x3e1   : > { %v706_v7 = vpop.xlane.xlu0 %705 }
 0x3e2   : > { %1479 = vrcp.f32 %v706_v7 }
 0x3e3   : > { %1481 = vrcp.f32 %v709_v6 }
 0x3e5   : > { %v715_v8 = vpop.xlane.xlu1 %714 }
 0x3e6   : > { %v712_v9 = vpop.xlane.xlu0 %711 }
 0x3e7   : > { %1483 = vrcp.f32 %v712_v9 }
 0x3e8   : > { %1485 = vrcp.f32 %v715_v8 }
 0x3e9   : > { %v875_v10 = vpop.permute.xlu1 %874 }
 0x3ea   : > { %1343 = vmatpush3.msra.mxu0 %v875_v10  ;;  %v799_v14 = vpop.permute.xlu0 %798 }
 0x3eb   : > { %1375 = vmatprep.subr.bf16.mxu0 %v1683_v0 }
 0x3ec   : > { %v1480_v11 = vpop.eup %1479 }
 0x3ed   : > { %v720_v12 = vmul.f32 %v1480_v11, %v1474_v61  ;;  %v1482_v13 = vpop.eup %1481  ;;  %v951_v19 = vpop.permute.xlu1 %950 }
 0x3ee   : > { %v721_v16 = vmul.f32 %v1482_v13, %v1472_v60 }
 0x3ef   : > { %1335 = vmatmul.mubr.msk.f32.vlgmr.msra.gmra.mrb[4].mxu1 %vm575_vm2, %v720_v12 }
 0x3f0   : > { %1338 = vmatpush3.msra.mxu1 %v799_v14  ;;  %1339 = vmatprep.mubr.msk.f32.mxu1 %vm1684_vm0, %v1685_v1 }
 0x3f1   : > { %v1484_v15 = vpop.eup %1483  ;;  %1347 = vmatprep.subr.mxu1 %v1685_v1 }
 0x3f2   : > { %v1486_v17 = vpop.eup %1485  ;;  %v722_v18 = vmul.f32 %v1484_v15, %v1478_v3 }
 0x3f3   : > { %1340 = vmatmul.mubr.msk.f32.vlgmr.msra.gmra.mrb[6].mxu1 %vm575_vm2, %v721_v16  ;;  %v723_v20 = vmul.f32 %v1486_v17, %v1476_v2 }
 0x3f4   : > { %1348 = vmatpush3.msra.mxu1 %v951_v19  ;;  %1345 = vmatmul.mubr.msk.f32.vlgmr.msra.gmra.mrb[4].mxu0 %vm575_vm2, %v722_v18 }
 0x3f5   : > { %1349 = vmatprep.mubr.msk.f32.mxu1 %vm1684_vm0, %v1685_v1  ;;  %1360 = vmatprep.mubr.msk.f32.mxu0 %vm1684_vm0, %v1685_v1 }
 0x3f6   : > { %1377 = vmatpush3.bf16.msra.mxu0 %v1376_v23 }
 0x3f7   : > { %1350 = vmatmul.mubr.msk.f32.vlgmr.msra.gmra.mrb[8].mxu1 %vm575_vm2, %v723_v20  ;;  %1378 = vmatprep.subr.bf16.mxu0 %v1683_v0 }
 0x3fa   : > { %1380 = vmatpush3.bf16.msra.mxu0 %v1379_v26 }
 0x4c2   : > { %v793_v27 = vpop.f32.mrb[4].mxu1 }
 0x4c3   : > { %v1336_v28 = vpop.f32.mrb[5].mxu1 }
 0x4c6   : > { %v870_v29 = vpop.f32.mrb[6].mxu1 }
 0x4c7   : > { %1027 = vrot.lane.b32.xlu0 %v870_v29, %s1689_s29  ;;  %v1341_v30 = vpop.f32.mrb[7].mxu1  ;;  %v946_v31 = vpop.f32.mrb[4].mxu0  ;;  %s1605_s29 = sshll.u32 %s1692_s30, 4  ;;  %s1606_s29 = int_to_ptr.vmem [resolvable:$false] %s1605_s29 }
 0x4c8   : > { %1031 = vrot.lane.b32.xlu1 %v946_v31, %s1690_s24  ;;  %v1346_v1 = vpop.f32.mrb[5].mxu0  ;;  %s1607_s24 = scalar_lea.vmem %s1606_s29, 256  ;;  %p1608_p12 = scmp.lt.s32.totalorder %s2037_s22, %s1606_s29 }
 0x4c9   : > { %p1609_p1 = scmp.lt.s32.totalorder %s1607_s24, %s1601_s13 }
 0x4ca   : > { %v1022_v32 = vpop.f32.mrb[8].mxu1 }
 0x4cb   : > { %1035 = vrot.lane.b32.xlu0 %v1022_v32, %s1691_s15  ;;  %v1351_v0 = vpop.f32.mrb[9].mxu1  ;;  %p1610_p2 = por %p1609_p1, %p1608_p12 }
 0x4cd   : > { %p1611_p4 = pnand %p1610_p2, %p1604_p7 }
 0x539   : > { %v1028_v33 = vpop.permute.xlu0 %1027 }
 0x53a   : > { %v1038_v34 = vsel %vm575_vm2, %v793_v27, %v1028_v33  ;;  %v1032_v35 = vpop.permute.xlu1 %1031 }
 0x53b   : > { %v1040_v36 = vsel %vm1039_vm4, %v1038_v34, %v1032_v35 }
 0x53d   : > { %v1036_v37 = vpop.permute.xlu0 %1035 }
 0x53e   : > { %v1042_v38 = vsel %vm1041_vm5, %v1040_v36, %v1036_v37 }
 0x53f   : > { %1361 = vmatmul.mubr.msk.f32.vlgmr.msra.gmra.mrb[6].mxu0 %vm404_vm1, %v1042_v38 }
 0x612   : > { %v1123_v40 = vpop.f32.mrb[6].mxu0 }
 0x613   : > { %v1124_v41 = vadd.f32 %v1268_v39, %v1123_v40  ;;  %v1362_v42 = vpop.f32.mrb[7].mxu0 }
 0x615   : > { %1127 = vst.msk [vmem:[%s391_s19] sm:$0xff] %vm404_vm1, %v1124_v41 }
 0x616   : > { %1614 = shalt.err (!%p1611_p4)
}
 0x617   : > { %s1615_s9 = scalar_lea.hbm %s2035_s21, 128  ;;  %s1619_s18 = scalar_lea.hbm %s2113_s26, 256 }
 0x618   : > { %p1616_p0 = scmp.ne.s32.totalorder %s2035_s21, %s1615_s9  ;;  %p1620_p8 = scmp.lt.u32.totalorder %s2035_s21, %s2113_s26 }
 0x619   : > { %p1621_p13 = scmp.lt.u32.totalorder %s1619_s18, %s1615_s9  ;;  %p1623_p10 = scmp.lt.u32.totalorder %s1615_s9, %s2035_s21 }
 0x61a   : > { %p1617_p9 = pnand %p1616_p0, %p1897_p5 }
 0x61b   : > { %p1622_p6 = por %p1621_p13, %p1620_p8 }
 0x61c   : > { %p1618_p11 = pneg %p1617_p9 }
 0x61d   : > { %p1624_p3 = por %p1623_p10, %p1622_p6 }
 0x61f   : > { %p1625_p7 = pnand %p1624_p3, %p1618_p11 }
 0x621   : > { %1628 = shalt.err (!%p1625_p7)
}
 0x622   : > { %1397 = dma.vmem_to_hbm [thread:$0]  (%p1897_p5), %s2037_s22, 128, %s2035_s21, %s1129_s20  }
 0x623 PF: > { %s2114_s25 = sld [smem:[#allocation15_spill]]  ;;  %s2115_s28 = sld [smem:[#allocation16_spill]] }
 0x624   : > { %p2117_p1 = scmp.ge.s32.totalorder %s1675_s12, 2 }
 0x629   : > { %s1154_s13 = sand.u32 1, %s2114_s25   ;;  %p2116_p12 = scmp.ne.s32.totalorder %s2115_s28, 0 }
 0x62a   : > { %s1155_s30 = scalar_lea.sflag [#allocation4], %s1154_s13 }
 0x62b   : > { %p1414_p2 = pnand %p2117_p1, %p2116_p12 }
 0x62d   : > { %1658 = dma.done.wait (!%p1414_p2), %s1155_s30, 128  }
 0x62e   : > { %1660 = vsyncadd (!%p1414_p2), %s1155_s30, 4294967168  ;;  %p24_p4 = scmp.ge.s32.totalorder %s1883_s14, 4   ;;  %s2118_s30 = smov %s1667_s10 }
 0x62f   : > { %s2119_s10 = smov %s1671_s11  ;;  %s2120_s11 = smov %s1893_s16 }
 0x630   : > { %s2121_s12 = smov %s1883_s14  ;;  %26 = sbr.rel (!%p24_p4) target bundleno = 9 (0x9), region = 113 }
 0x637   :  { %1160 = vsyncpa [#allocation3], 1 }
 0x638   :  { %1162 = vsyncpa [#allocation3 + $0x1], 1 }
 0x639   :  { %1163 = vsyncpa [#allocation6], 1 }
 0x63a   :  { %1164 = vsyncpa [#allocation9], 1 }
 0x63b   :  { %1165 = vsyncpa [#allocation4], 1 }
 0x63c   :  { %1167 = vsyncpa [#allocation4 + $0x1], 1 }

</bundles_post_ra>
